<compile_context>
chip_gen: v6e
topology: v6e:2x2x1
jax: 0.10.0
libtpu: 0.0.40
codegen_flags: <defaults>
</compile_context>

<pallas_src>
import functools

import jax
import jax.numpy as jnp
from jax.experimental import pallas as pl
from jax.experimental.pallas import tpu as pltpu


def _svdpp_kernel(u_ref, v_ref, m_ref, out_ref, *, w1, w4):
    # u_ref, v_ref, m_ref: (D, TB) f32 in VMEM (batch on lanes)
    # out_ref:             (1, 3, TB) f32 — rows: [inference, ssq_u, ssq_v]
    u = u_ref[...].astype(jnp.float32)
    v = v_ref[...].astype(jnp.float32)
    m = m_ref[...].astype(jnp.float32)

    dot_uv = jnp.sum(u * v, axis=0, keepdims=True)   # (1, TB)  sublane reduce -> lane-dense
    dot_mv = jnp.sum(m * v, axis=0, keepdims=True)   # (1, TB)
    ssq_u = jnp.sum(u * u, axis=0, keepdims=True)    # (1, TB)
    ssq_v = jnp.sum(v * v, axis=0, keepdims=True)    # (1, TB)

    inf = w1 * dot_uv + w4 * dot_mv                  # (1, TB)
    out_ref[...] = jnp.concatenate([inf, ssq_u, ssq_v], axis=0)[None]   # (1, 3, TB)


def _round_up(x, m):
    return ((x + m - 1) // m) * m


def _pick_batch_tile(batch, dim, target_vmem_bytes=24 * 1024 * 1024, max_tile=2048):
    """Largest batch tile (multiple of 128 lanes) whose double-buffered blocks fit VMEM.

    Accounts for layout padding: the (D, tb) f32 block occupies roundup(D, 8) * tb * 4 bytes
    (tb is already a multiple of 128), the (1, 3, tb) output pads its sublane dim to 8."""
    d_pad = _round_up(max(int(dim), 1), 8)
    bytes_per_col = 2 * (3 * d_pad + 8) * 4          # 3 inputs + 1 output, double buffered
    tb = (target_vmem_bytes // bytes_per_col) // 128 * 128
    tb = max(128, min(int(tb), max_tile))
    b_pad = _round_up(int(batch), 128)
    if b_pad > 128:
        # Keep >= 2 grid steps so the "parallel" batch axis can split across v7x's 2 TCs.
        tb = min(tb, max(128, _round_up((b_pad + 1) // 2, 128)))
    else:
        tb = 128
    return tb


def svdpp_pallas(u_emb, v_emb, m_emb, *, w1=1.0, w4=1.0, tile_b=None):
    """u_emb, v_emb, m_emb: [B, D] f32 (m_emb = mean of gathered ratings rows).

    Returns (inference [B, 1], sum_sq_u scalar, sum_sq_v scalar)."""
    B, D = u_emb.shape

    tb = tile_b if tile_b is not None else _pick_batch_tile(B, D)
    assert tb % 128 == 0, "batch tile must be a multiple of 128 (lane width)"
    num_tiles = int(pl.cdiv(B, tb))
    b_pad = num_tiles * tb

    def prep(x):
        x = x.astype(jnp.float32)
        if b_pad != B:
            x = jnp.pad(x, ((0, b_pad - B), (0, 0)))   # zero rows: contribute 0 everywhere
        return x.T                                      # (D, b_pad): batch on lanes

    u_t, v_t, m_t = prep(u_emb), prep(v_emb), prep(m_emb)

    kernel = functools.partial(_svdpp_kernel, w1=float(w1), w4=float(w4))

    flops = int(7 * b_pad * D)
    bytes_accessed = int(4 * (3 * b_pad * D + 3 * b_pad))

    in_spec = pl.BlockSpec((D, tb), lambda t: (0, t))

    out = pl.pallas_call(
        kernel,
        out_shape=jax.ShapeDtypeStruct((num_tiles, 3, tb), jnp.float32),
        grid=(num_tiles,),
        in_specs=[in_spec, in_spec, in_spec],
        out_specs=pl.BlockSpec((1, 3, tb), lambda t: (t, 0, 0)),
        compiler_params=pltpu.CompilerParams(
            dimension_semantics=("parallel",),
            vmem_limit_bytes=32 * 1024 * 1024,
        ),
        cost_estimate=pl.CostEstimate(flops=flops, transcendentals=0,
                                      bytes_accessed=bytes_accessed),
    )(u_t, v_t, m_t)

    inference = out[:, 0, :].reshape(b_pad)[:B].reshape(B, 1)
    ssq_u = jnp.sum(out[:, 1, :])       # padded rows are zero -> contribute nothing
    ssq_v = jnp.sum(out[:, 2, :])
    return inference, ssq_u, ssq_v


@functools.partial(jax.jit, static_argnames=("w1", "w4", "tile_b"))
def _svdpp_forward(users_table, items_table, ratings_table, reg,
                   users, items, users_ratings, *, w1, w4, tile_b):
    # Row gathers + ratings mean stay in XLA (they fuse under jit); only three [B, D]
    # tensors reach the Pallas kernel — the [B, R, D] tensor is never materialized in HBM.
    u_emb = jnp.take(users_table, users, axis=0)                    # [B, D]
    v_emb = jnp.take(items_table, items, axis=0)                    # [B, D]
    m_emb = jnp.mean(jnp.take(ratings_table, users_ratings, axis=0), axis=1)  # [B, D]

    inference, ssq_u, ssq_v = svdpp_pallas(
        u_emb, v_emb, m_emb, w1=w1, w4=w4, tile_b=tile_b)
    regs = reg * (jnp.sqrt(ssq_v) + jnp.sqrt(ssq_u))
    return inference, regs


class SVDPlusPlusPallas:
    """JAX/Pallas port of the PyTorch `SVD_plus_plus` module's forward pass."""

    def __init__(self, num_users, num_items, embedding_dim, reg, key):
        ku, ki, kur, kir = jax.random.split(key, 4)
        # nn.Embedding default init ~ N(0, 1); deterministic synthetic params.
        self.users_embedding_table = jax.random.normal(
            ku, (num_users, embedding_dim), dtype=jnp.float32)
        self.items_embedding_table = jax.random.normal(
            ki, (num_items, embedding_dim), dtype=jnp.float32)
        # padding_idx=0 -> zero row.
        self.users_ratings_table = jax.random.normal(
            kur, (num_items + 1, embedding_dim), dtype=jnp.float32).at[0].set(0.0)
        # Exists in __init__ but unused in forward (matches the torch module).
        self.items_ratings_table = jax.random.normal(
            kir, (num_users + 1, embedding_dim), dtype=jnp.float32).at[0].set(0.0)
        self.reg = jnp.float32(reg)
        self._W1, self._W4 = 1.0, 1.0

    def forward(self, users, items, users_ratings, items_ratings=None, *, tile_b=None):
        # users_ratings: dense [B, R] int32 item indices; 0 == padding.
        # (torch takes a sparse tensor and calls .to_dense(); we consume the dense matrix.)
        return _svdpp_forward(
            self.users_embedding_table, self.items_embedding_table,
            self.users_ratings_table, self.reg,
            users, items, users_ratings,
            w1=self._W1, w4=self._W4, tile_b=tile_b)


if __name__ == "__main__":
    num_users, num_items, embedding_dim, reg = 48, 64, 32, 0.01
    B, R = 200, 12   # B > 128 exercises the multi-tile grid + batch-padding path (tb=128, 2 tiles)

    key = jax.random.PRNGKey(0)
    kparams, kusers, kitems, kr, kmask = jax.random.split(key, 5)

    model = SVDPlusPlusPallas(num_users, num_items, embedding_dim, reg, kparams)

    users = jax.random.randint(kusers, (B,), 0, num_users, dtype=jnp.int32)
    items = jax.random.randint(kitems, (B,), 0, num_items, dtype=jnp.int32)
    # Dense implicit-feedback index matrix: entries in [1, num_items], 0 == padding.
    ratings = jax.random.randint(kr, (B, R), 1, num_items + 1, dtype=jnp.int32)
    keep = jax.random.bernoulli(kmask, 0.7, (B, R))
    users_ratings = jnp.where(keep, ratings, 0).astype(jnp.int32)

    inference, regs = model.forward(users, items, users_ratings)
    inference = jax.block_until_ready(inference)
    regs = jax.block_until_ready(regs)

    # Pure-JAX reference.
    u_ref = model.users_embedding_table[users]
    v_ref = model.items_embedding_table[items]
    m_ref = model.users_ratings_table[users_ratings].mean(axis=1)
    inf_ref = (u_ref * v_ref).sum(axis=1, keepdims=True) + \
              (m_ref * v_ref).sum(axis=1, keepdims=True)
    regs_ref = model.reg * (jnp.linalg.norm(v_ref) + jnp.linalg.norm(u_ref))

    assert inference.shape == (B, 1)
    assert jnp.allclose(inference, inf_ref, rtol=1e-5, atol=1e-4)
    assert jnp.allclose(regs, regs_ref, rtol=1e-5, atol=1e-4)

    print("KERNEL_OK")
</pallas_src>

<mosaic_0001>
module attributes {stable_mosaic.version = 11 : i64} {
  func.func @_svdpp_kernel(%arg0: i32, %arg1: memref<32x128xf32, #tpu.memory_space<vmem>>, %arg2: memref<32x128xf32, #tpu.memory_space<vmem>>, %arg3: memref<32x128xf32, #tpu.memory_space<vmem>>, %arg4: memref<1x3x128xf32, #tpu.memory_space<vmem>>) attributes {dimension_semantics = [#tpu.dimension_semantics<parallel>], iteration_bounds = array<i64: 2>, scalar_prefetch = 0 : i64, scratch_operands = 0 : i64, tpu.core_type = #tpu.core_type<tc>, window_params = [{transform_indices = @transform_0, window_bounds = array<i64: 32, 128>}, {transform_indices = @transform_1, window_bounds = array<i64: 32, 128>}, {transform_indices = @transform_2, window_bounds = array<i64: 32, 128>}, {transform_indices = @transform_3, window_bounds = array<i64: 1, 3, 128>}]} {
    %c0 = arith.constant 0 : index
    %c0_0 = arith.constant 0 : index
    %0 = vector.load %arg1[%c0, %c0_0] : memref<32x128xf32, #tpu.memory_space<vmem>>, vector<32x128xf32>
    %c0_1 = arith.constant 0 : index
    %c0_2 = arith.constant 0 : index
    %1 = vector.load %arg2[%c0_1, %c0_2] : memref<32x128xf32, #tpu.memory_space<vmem>>, vector<32x128xf32>
    %c0_3 = arith.constant 0 : index
    %c0_4 = arith.constant 0 : index
    %2 = vector.load %arg3[%c0_3, %c0_4] : memref<32x128xf32, #tpu.memory_space<vmem>>, vector<32x128xf32>
    %3 = arith.mulf %0, %1 : vector<32x128xf32>
    %cst = arith.constant dense<0.000000e+00> : vector<128xf32>
    %4 = vector.multi_reduction <add>, %3, %cst [0] : vector<32x128xf32> to vector<128xf32>
    %5 = vector.shape_cast %4 : vector<128xf32> to vector<1x128xf32>
    %6 = arith.mulf %2, %1 : vector<32x128xf32>
    %cst_5 = arith.constant dense<0.000000e+00> : vector<128xf32>
    %7 = vector.multi_reduction <add>, %6, %cst_5 [0] : vector<32x128xf32> to vector<128xf32>
    %8 = vector.shape_cast %7 : vector<128xf32> to vector<1x128xf32>
    %9 = arith.mulf %0, %0 : vector<32x128xf32>
    %cst_6 = arith.constant dense<0.000000e+00> : vector<128xf32>
    %10 = vector.multi_reduction <add>, %9, %cst_6 [0] : vector<32x128xf32> to vector<128xf32>
    %11 = vector.shape_cast %10 : vector<128xf32> to vector<1x128xf32>
    %12 = arith.mulf %1, %1 : vector<32x128xf32>
    %cst_7 = arith.constant dense<0.000000e+00> : vector<128xf32>
    %13 = vector.multi_reduction <add>, %12, %cst_7 [0] : vector<32x128xf32> to vector<128xf32>
    %14 = vector.shape_cast %13 : vector<128xf32> to vector<1x128xf32>
    %cst_8 = arith.constant 1.000000e+00 : f32
    %15 = vector.broadcast %cst_8 : f32 to vector<1x128xf32>
    %16 = arith.mulf %15, %5 : vector<1x128xf32>
    %cst_9 = arith.constant 1.000000e+00 : f32
    %17 = vector.broadcast %cst_9 : f32 to vector<1x128xf32>
    %18 = arith.mulf %17, %8 : vector<1x128xf32>
    %19 = arith.addf %16, %18 : vector<1x128xf32>
    %20 = tpu.concatenate %19, %11, %14 in 0 : vector<1x128xf32>, vector<1x128xf32>, vector<1x128xf32> -> vector<3x128xf32>
    %21 = vector.shape_cast %20 : vector<3x128xf32> to vector<1x3x128xf32>
    %c0_10 = arith.constant 0 : index
    %c0_11 = arith.constant 0 : index
    %c0_12 = arith.constant 0 : index
    %22 = vector.load %arg4[%c0_10, %c0_11, %c0_12] : memref<1x3x128xf32, #tpu.memory_space<vmem>>, vector<1x3x128xf32>
    tpu.vector_store %arg4[%c0_10, %c0_11, %c0_12], %21 {strides = array<i32>} : memref<1x3x128xf32, #tpu.memory_space<vmem>>, vector<1x3x128xf32>,
    return
  }
  func.func @transform_0(%arg0: i32) -> (i32, i32) {
    %c0_i32 = arith.constant 0 : i32
    %c0_i32_0 = arith.constant 0 : i32
    return %c0_i32, %arg0 : i32, i32
  }
  func.func @transform_1(%arg0: i32) -> (i32, i32) {
    %c0_i32 = arith.constant 0 : i32
    %c0_i32_0 = arith.constant 0 : i32
    return %c0_i32, %arg0 : i32, i32
  }
  func.func @transform_2(%arg0: i32) -> (i32, i32) {
    %c0_i32 = arith.constant 0 : i32
    %c0_i32_0 = arith.constant 0 : i32
    return %c0_i32, %arg0 : i32, i32
  }
  func.func @transform_3(%arg0: i32) -> (i32, i32, i32) {
    %c0_i32 = arith.constant 0 : i32
    %c0_i32_0 = arith.constant 0 : i32
    %c0_i32_1 = arith.constant 0 : i32
    return %arg0, %c0_i32, %c0_i32_0 : i32, i32, i32
  }
}

</mosaic_0001>

<bundles_post_ra>
// kernel: _svdpp_forward.1
= control target key start
LH: loop header
LB: loop body
LE: loop exit
PB: predicated region body
PF: predicated region fallthrough
CT: control target
= control target key end

     0   :  { %s600_s12 = smov 0   ;;  %s602_s13 = smov 0   ;;  %s674_s0 = inlined_call_operand.vmem [shape: f32[32,256], index: 0, kind: input, shape index: {}]   ;;  %s675_s1 = inlined_call_operand.vmem [shape: f32[32,256], index: 1, kind: input, shape index: {}]   ;;  %s676_s2 = inlined_call_operand.vmem [shape: f32[32,256], index: 2, kind: input, shape index: {}]   ;;  %s677_s3 = inlined_call_operand.vmem [shape: f32[2,3,128], index: 3, kind: output, shape index: {}]  }
   0x1   :  { %s604_s14 = smov 0  }
   0x2 LB: > { %s515_s15 = sadd.s32 4294967295, %s578_s14   ;;  %s617_s16 = sadd.s32 1, %s578_s14   ;;  %s578_s14 = sphi %s604_s14, %s681_s14   ;;  %s574_s13 = sphi %s602_s13, %s680_s13   ;;  %s570_s12 = sphi %s600_s12, %s679_s12  }
   0x3   : > { %s17_s17 = ssub.s32 %s578_s14, %s617_s16  ;;  %s20_s18 = sadd.s32 1, %s574_s13 }
   0x4   : > { %p18_p0 = scmp.eq.s32.totalorder %s17_s17, 0  ;;  %p27_p1 = scmp.ne.s32.totalorder %s574_s13, %s570_s12 }
   0x5   : > { %p28_p2 = scmp.eq.s32.totalorder %s578_s14, 0  ;;  %p518_p4 = scmp.ge.s32.totalorder %s578_s14, 2 }
   0x6   : > { %s626_s19 = scalar_select %p18_p0, %s574_s13, %s20_s18  }
   0x7   : > { %p628_p3 = por %p28_p2, %p27_p1  ;;  %131 = sbr.rel (%p518_p4) target bundleno = 30 (0x1e), region = 16 }
   0xc   : > { %134 = sbr.rel (!%p628_p3) target bundleno = 18 (0x12), region = 20  ;;  %s136_s21 = sand.u32 (%p628_p3), 1, %s574_s13  }
   0xd   : > { %s520_s22 = sshll.u32 (%p628_p3), %s578_s14, 3  ;;  %s519_s23 = sshll.u32 (%p628_p3), %s136_s21, 5 }
   0xe   : > { %s140_s26 = scalar_lea.vmem (%p628_p3), %s674_s0, %s520_s22  ;;  %s138_s27 = scalar_lea.vmem (%p628_p3), [#allocation2], %s519_s23 }
   0xf   : > { %v175_v0 = vld [vmem:[%s140_s26] sm:$0xff] (%p628_p3)  ;;  %v177_v1 = vld [vmem:[%s140_s26 + $0x10] sm:$0xff] (%p628_p3) }
  0x10   : > { %v179_v2 = vld [vmem:[%s140_s26 + $0x20] sm:$0xff] (%p628_p3)  ;;  %176 = vst [vmem:[%s138_s27] sm:$0xff] (%p628_p3), %v175_v0  ;;  %178 = vst [vmem:[%s138_s27 + $0x8] sm:$0xff] (%p628_p3), %v177_v1  ;;  %v181_v3 = vld [vmem:[%s140_s26 + $0x30] sm:$0xff] (%p628_p3) }
  0x11   : > { %180 = vst [vmem:[%s138_s27 + $0x10] sm:$0xff] %v179_v2  ;;  %182 = vst [vmem:[%s138_s27 + $0x18] sm:$0xff] %v181_v3 }
  0x12 PF: > { %188 = sbr.rel (!%p628_p3) target bundleno = 24 (0x18), region = 58  ;;  %s190_s28 = sand.u32 (%p628_p3), 1, %s574_s13  }
  0x13   : > { %s522_s29 = sshll.u32 (%p628_p3), %s578_s14, 3  ;;  %s521_s30 = sshll.u32 (%p628_p3), %s190_s28, 5 }
  0x14   : > { %s194_s6 = scalar_lea.vmem (%p628_p3), %s675_s1, %s522_s29  ;;  %s192_s7 = scalar_lea.vmem (%p628_p3), [#allocation3], %s521_s30 }
  0x15   : > { %v229_v4 = vld [vmem:[%s194_s6] sm:$0xff] (%p628_p3)  ;;  %v231_v5 = vld [vmem:[%s194_s6 + $0x10] sm:$0xff] (%p628_p3) }
  0x16   : > { %v233_v6 = vld [vmem:[%s194_s6 + $0x20] sm:$0xff] (%p628_p3)  ;;  %230 = vst [vmem:[%s192_s7] sm:$0xff] (%p628_p3), %v229_v4  ;;  %232 = vst [vmem:[%s192_s7 + $0x8] sm:$0xff] (%p628_p3), %v231_v5  ;;  %v235_v7 = vld [vmem:[%s194_s6 + $0x30] sm:$0xff] (%p628_p3) }
  0x17   : > { %234 = vst [vmem:[%s192_s7 + $0x10] sm:$0xff] %v233_v6  ;;  %236 = vst [vmem:[%s192_s7 + $0x18] sm:$0xff] %v235_v7 }
  0x18 PF: > { %242 = sbr.rel (!%p628_p3) target bundleno = 30 (0x1e), region = 96  ;;  %s244_s8 = sand.u32 (%p628_p3), 1, %s574_s13  }
  0x19   : > { %s524_s9 = sshll.u32 (%p628_p3), %s578_s14, 3  ;;  %s523_s10 = sshll.u32 (%p628_p3), %s244_s8, 5 }
  0x1a   : > { %s248_s18 = scalar_lea.vmem (%p628_p3), %s676_s2, %s524_s9  ;;  %s246_s21 = scalar_lea.vmem (%p628_p3), [#allocation4], %s523_s10 }
  0x1b   : > { %v283_v8 = vld [vmem:[%s248_s18] sm:$0xff] (%p628_p3)  ;;  %v285_v9 = vld [vmem:[%s248_s18 + $0x10] sm:$0xff] (%p628_p3) }
  0x1c   : > { %v287_v10 = vld [vmem:[%s248_s18 + $0x20] sm:$0xff] (%p628_p3)  ;;  %284 = vst [vmem:[%s246_s21] sm:$0xff] (%p628_p3), %v283_v8  ;;  %286 = vst [vmem:[%s246_s21 + $0x8] sm:$0xff] (%p628_p3), %v285_v9  ;;  %v289_v11 = vld [vmem:[%s248_s18 + $0x30] sm:$0xff] (%p628_p3) }
  0x1d   : > { %288 = vst [vmem:[%s246_s21 + $0x10] sm:$0xff] %v287_v10  ;;  %290 = vst [vmem:[%s246_s21 + $0x18] sm:$0xff] %v289_v11 }
  0x1e PF: > { %p525_p5 = scmp.ge.s32.totalorder %s578_s14, 1  ;;  %p295_p6 = scmp.lt.s32.totalorder %s578_s14, 3 }
  0x20   : > { %p296_p7 = pnand %p525_p5, %p295_p6 }
  0x21   : > { %s302_s20 = sand.u32 (!%p296_p7), 1, %s570_s12   ;;  %p346_p8 = scmp.lt.s32.totalorder (!%p296_p7), %s515_s15, 1 }
  0x22   : > { %299 = sbr.rel (%p296_p7) target bundleno = 68 (0x44), region = 134  ;;  %s526_s22 = sshll.u32 (!%p296_p7), %s302_s20, 5 }
  0x23   : > { %s304_s23 = scalar_lea.vmem (!%p296_p7), [#allocation2], %s526_s22  ;;  %s311_s24 = scalar_lea.vmem (!%p296_p7), [#allocation3], %s526_s22 }
  0x24   : > { %s318_s25 = scalar_lea.vmem (!%p296_p7), [#allocation4], %s526_s22 }
  0x27   : > { %v350_v12 = vld [vmem:[%s304_s23] sm:$0xff]  ;;  %v351_v13 = vld [vmem:[%s304_s23 + $0x8] sm:$0xff]  ;;  %v352_v14 = vld [vmem:[%s304_s23 + $0x10] sm:$0xff]  ;;  %s683_s15 = smov (!%p346_p8, %s515_s15), 1  ;;  %vm415_vm0 = vcmask 1040384   ;;  %vm417_vm1 = vcmask 1041408  }
  0x28   : > { %v353_v15 = vld [vmem:[%s304_s23 + $0x18] sm:$0xff]  ;;  %v354_v16 = vld [vmem:[%s311_s24] sm:$0xff]  ;;  %v355_v17 = vld [vmem:[%s311_s24 + $0x8] sm:$0xff]  ;;  %v388_v18 = vmul.f32 %v350_v12, %v350_v12  ;;  %v389_v19 = vmul.f32 %v351_v13, %v351_v13  ;;  %v390_v20 = vmul.f32 %v352_v14, %v352_v14  ;;  %s529_s12 = sshll.u32 %s683_s15, 2 }
  0x29   : > { %v356_v21 = vld [vmem:[%s311_s24 + $0x10] sm:$0xff]  ;;  %v357_v22 = vld [vmem:[%s311_s24 + $0x18] sm:$0xff]  ;;  %v358_v23 = vld [vmem:[%s318_s25] sm:$0xff]  ;;  %v362_v24 = vmul.f32 %v354_v16, %v350_v12  ;;  %v363_v25 = vmul.f32 %v355_v17, %v351_v13  ;;  %v391_v26 = vmul.f32 %v353_v15, %v353_v15  ;;  %v401_v33 = vmul.f32 %v354_v16, %v354_v16  ;;  %s349_s28 = scalar_lea.vmem %s677_s3, %s529_s12 }
  0x2a   : > { %v359_v27 = vld [vmem:[%s318_s25 + $0x8] sm:$0xff]  ;;  %v360_v28 = vld [vmem:[%s318_s25 + $0x10] sm:$0xff]  ;;  %v361_v29 = vld [vmem:[%s318_s25 + $0x18] sm:$0xff]  ;;  %v364_v30 = vmul.f32 %v356_v21, %v352_v14  ;;  %v375_v31 = vmul.f32 %v358_v23, %v354_v16  ;;  %v392_v32 = vadd.f32 %v389_v19, %v388_v18  ;;  %v365_v34 = vmul.f32 %v357_v22, %v353_v15 }
  0x2b   : > { %v366_v35 = vadd.f32 %v363_v25, %v362_v24  ;;  %v376_v36 = vmul.f32 %v359_v27, %v355_v17  ;;  %v377_v37 = vmul.f32 %v360_v28, %v356_v21  ;;  %v402_v39 = vmul.f32 %v355_v17, %v355_v17 }
  0x2c   : > { %v393_v38 = vadd.f32 %v392_v32, %v390_v20  ;;  %v403_v40 = vmul.f32 %v356_v21, %v356_v21  ;;  %v378_v42 = vmul.f32 %v361_v29, %v357_v22  ;;  %v404_v45 = vmul.f32 %v357_v22, %v357_v22 }
  0x2d   : > { %v367_v41 = vadd.f32 %v366_v35, %v364_v30  ;;  %v379_v43 = vadd.f32 %v376_v36, %v375_v31  ;;  %v405_v46 = vadd.f32 %v402_v39, %v401_v33 }
  0x2e   : > { %v394_v44 = vadd.f32 %v393_v38, %v391_v26 }
  0x2f   : > { %v368_v47 = vadd.f32 %v367_v41, %v365_v34  ;;  %v380_v48 = vadd.f32 %v379_v43, %v377_v37  ;;  %v406_v50 = vadd.f32 %v405_v46, %v403_v40 }
  0x30   : > { %v395_v49 = vrot.slane %v394_v44, 4 }
  0x31   : > { %v369_v51 = vrot.slane %v368_v47, 4  ;;  %v381_v52 = vadd.f32 %v380_v48, %v378_v42  ;;  %v407_v54 = vadd.f32 %v406_v50, %v404_v45 }
  0x32   : > { %v396_v53 = vadd.f32 %v395_v49, %v394_v44 }
  0x33   : > { %v370_v55 = vadd.f32 %v369_v51, %v368_v47  ;;  %v382_v56 = vrot.slane %v381_v52, 4  ;;  %v408_v58 = vrot.slane %v407_v54, 4 }
  0x34   : > { %v397_v57 = vrot.slane %v396_v53, 2 }
  0x35   : > { %v371_v59 = vrot.slane %v370_v55, 2  ;;  %v383_v60 = vadd.f32 %v382_v56, %v381_v52  ;;  %v409_v62 = vadd.f32 %v408_v58, %v407_v54 }
  0x36   : > { %v398_v61 = vadd.f32 %v397_v57, %v396_v53 }
  0x37   : > { %v372_v63 = vadd.f32 %v371_v59, %v370_v55  ;;  %v384_v0 = vrot.slane %v383_v60, 2  ;;  %v410_v1 = vrot.slane %v409_v62, 2 }
  0x38   : > { %v399_v4 = vrot.slane %v398_v61, 1 }
  0x39   : > { %v373_v2 = vrot.slane %v372_v63, 1  ;;  %v385_v3 = vadd.f32 %v384_v0, %v383_v60  ;;  %v411_v5 = vadd.f32 %v410_v1, %v409_v62 }
  0x3a   : > { %v400_v10 = vadd.f32 %v399_v4, %v398_v61 }
  0x3b   : > { %v374_v6 = vadd.f32 %v373_v2, %v372_v63  ;;  %v386_v7 = vrot.slane %v385_v3, 1  ;;  %v412_v8 = vrot.slane %v411_v5, 1 }
  0x3d   : > { %v387_v9 = vadd.f32 %v386_v7, %v385_v3  ;;  %v413_v11 = vadd.f32 %v412_v8, %v411_v5 }
  0x3f   : > { %v414_v12 = vadd.f32 %v387_v9, %v374_v6 }
  0x41   : > { %v416_v13 = vsel %vm415_vm0, %v414_v12, %v400_v10 }
  0x42   : > { %v418_v14 = vsel %vm417_vm1, %v416_v13, %v413_v11 }
  0x43   : > { %419 = vst [vmem:[%s349_s28] sm:$0x7] %v418_v14 }
  0x44 PF: > { %p10_p9 = scmp.ge.s32.totalorder %s617_s16, 4   ;;  %s679_s12 = smov %s574_s13 }
  0x45   : > { %s680_s13 = smov %s626_s19  ;;  %s681_s14 = smov %s617_s16 }
  0x46   :  { %12 = sbr.rel (!%p10_p9) target bundleno = 2 (0x2), region = 197 }

</bundles_post_ra>
